<compile_context>
chip_gen: v7x
topology: tpu7x:2x2x1
jax: 0.10.0
libtpu: 0.0.40
codegen_flags: <defaults>
</compile_context>

<pallas_src>
import functools

import numpy as np
import jax
import jax.numpy as jnp
from jax.experimental import pallas as pl
from jax.experimental.pallas import tpu as pltpu

WIN_SIZE = 11
WIN_SIGMA = 1.5
DATA_RANGE = 1.0
K1, K2 = 0.01, 0.03
C1 = (K1 * DATA_RANGE) ** 2
C2 = (K2 * DATA_RANGE) ** 2

LANE_TILE = 128  # image pairs per grid step, placed on the lane axis


def _gaussian_window_1d(size=WIN_SIZE, sigma=WIN_SIGMA):
    # Matches pytorch_msssim._fspecial_gauss_1d
    coords = np.arange(size, dtype=np.float64) - size // 2
    g = np.exp(-(coords ** 2) / (2.0 * sigma ** 2))
    g = g / g.sum()
    return g.astype(np.float32)


def _full_filter_matrix(h, w):
    """Dense valid 2-D Gaussian operator A (ho*wo, h*w): filtered = A @ vec(img)."""
    win = _gaussian_window_1d()
    win2d = np.outer(win, win).astype(np.float32)
    ho, wo = h - WIN_SIZE + 1, w - WIN_SIZE + 1
    a = np.zeros((ho * wo, h * w), dtype=np.float32)
    for o in range(ho):
        for q in range(wo):
            blk = np.zeros((h, w), dtype=np.float32)
            blk[o:o + WIN_SIZE, q:q + WIN_SIZE] = win2d
            a[o * wo + q, :] = blk.reshape(-1)
    return a


def _band_matrices(h, w):
    """Separable band operators for the pure-JAX reference."""
    win = _gaussian_window_1d()
    ho = h - WIN_SIZE + 1
    wo = w - WIN_SIZE + 1
    a_h = np.zeros((ho, h), dtype=np.float32)
    for o in range(ho):
        a_h[o, o:o + WIN_SIZE] = win
    a_w = np.zeros((w, wo), dtype=np.float32)
    for o in range(wo):
        a_w[o:o + WIN_SIZE, o] = win
    return a_h, a_w


def _combined_loss_kernel(x_ref, y_ref, a_ref, out_ref, m_ref, *, tb):
    # x_ref/y_ref: (P, TB) -- pixels on sublanes, batch on lanes (lane-dense).
    x = x_ref[...].astype(jnp.float32)
    y = y_ref[...].astype(jnp.float32)

    # Five moments stacked along the lane axis; products computed in f32,
    # cast to bf16 only at the store into the MXU-operand scratch.
    m_ref[:, 0 * tb:1 * tb] = x.astype(jnp.bfloat16)
    m_ref[:, 1 * tb:2 * tb] = y.astype(jnp.bfloat16)
    m_ref[:, 2 * tb:3 * tb] = (x * x).astype(jnp.bfloat16)
    m_ref[:, 3 * tb:4 * tb] = (y * y).astype(jnp.bfloat16)
    m_ref[:, 4 * tb:5 * tb] = (x * y).astype(jnp.bfloat16)

    # One lane-dense valid-Gaussian pass for all five moments:
    # (ho*wo, P) @ (P, 5*TB), bf16 operands, f32 accumulation on the MXU.
    f = jnp.dot(a_ref[...], m_ref[...], preferred_element_type=jnp.float32)

    mu1 = f[:, 0 * tb:1 * tb]
    mu2 = f[:, 1 * tb:2 * tb]
    ex2 = f[:, 2 * tb:3 * tb]
    ey2 = f[:, 3 * tb:4 * tb]
    exy = f[:, 4 * tb:5 * tb]

    mu1_sq = mu1 * mu1
    mu2_sq = mu2 * mu2
    mu1_mu2 = mu1 * mu2
    sigma1_sq = ex2 - mu1_sq
    sigma2_sq = ey2 - mu2_sq
    sigma12 = exy - mu1_mu2

    # ssim_map = (2*mu1*mu2+C1)/(mu1^2+mu2^2+C1) * (2*s12+C2)/(s1+s2+C2),
    # both divisions fused into a single approx reciprocal (EUP slot).
    num = (2.0 * mu1_mu2 + C1) * (2.0 * sigma12 + C2)
    den = (mu1_sq + mu2_sq + C1) * (sigma1_sq + sigma2_sq + C2)
    ssim_map = num * pl.reciprocal(den, approx=True)            # (ho*wo, TB)

    # SmoothL1 (beta = 1.0) element terms, directly from the f32 inputs.
    d = x - y
    ad = jnp.abs(d)
    sl1 = jnp.where(ad < 1.0, 0.5 * d * d, ad - 0.5)             # (P, TB)

    # Per-image (per-lane) partial sums; means / alpha combination in wrapper.
    out_ref[...] = jnp.concatenate(
        [jnp.sum(ssim_map, axis=0, keepdims=True),
         jnp.sum(sl1, axis=0, keepdims=True)], axis=0)           # (2, TB)


def combined_loss(img1, img2, alpha=0.8):
    """img1, img2: NCHW arrays with C == 1 (SSIM was built with channel=1)."""
    n, c, h, w = img1.shape
    assert c == 1, "SSIM was constructed with channel=1"
    assert h >= WIN_SIZE and w >= WIN_SIZE, "spatial dims must be >= win_size"
    ho, wo = h - WIN_SIZE + 1, w - WIN_SIZE + 1
    p = h * w
    w2 = ho * wo
    b = n * c

    tb = LANE_TILE
    n_steps = pl.cdiv(b, tb)
    if n_steps > 1 and n_steps % 2 == 1:
        n_steps += 1  # even parallel step count keeps v7x's 2 TCs balanced
    b_pad = n_steps * tb

    # Batch onto the lane axis (layout plumbing in the wrapper, not compute).
    x = jnp.transpose(img1.reshape(b, p))     # (P, B)
    y = jnp.transpose(img2.reshape(b, p))
    if b_pad != b:
        x = jnp.pad(x, ((0, 0), (0, b_pad - b)))
        y = jnp.pad(y, ((0, 0), (0, b_pad - b)))

    a_full = jnp.asarray(_full_filter_matrix(h, w), dtype=jnp.bfloat16)  # (W2, P)

    kern = functools.partial(_combined_loss_kernel, tb=tb)
    partials = pl.pallas_call(
        kern,
        out_shape=jax.ShapeDtypeStruct((2, b_pad), jnp.float32),
        grid=(n_steps,),
        in_specs=[
            pl.BlockSpec((p, tb), lambda i: (0, i)),
            pl.BlockSpec((p, tb), lambda i: (0, i)),
            pl.BlockSpec((w2, p), lambda i: (0, 0)),
        ],
        out_specs=pl.BlockSpec((2, tb), lambda i: (0, i)),
        scratch_shapes=[pltpu.VMEM((p, 5 * tb), jnp.bfloat16)],
        compiler_params=pltpu.CompilerParams(
            dimension_semantics=("parallel",)),
    )(x, y, a_full)

    # Padded lanes / padded grid steps are simply ignored here.
    ssim_mean = jnp.sum(partials[0, :b]) / (b * w2)
    sl1_mean = jnp.sum(partials[1, :b]) / (b * p)
    alpha = jnp.float32(alpha)
    return alpha * (1.0 - ssim_mean) + (1.0 - alpha) * sl1_mean


def _combined_loss_ref(img1, img2, alpha=0.8):
    # Pure-JAX f32 reference (faithful to pytorch_msssim + SmoothL1Loss).
    n, c, h, w = img1.shape
    a_h, a_w = _band_matrices(h, w)
    x = img1.reshape(n * c, h, w).astype(jnp.float32)
    y = img2.reshape(n * c, h, w).astype(jnp.float32)

    def filt(v):
        return jnp.einsum("oh,bhw,wq->boq", a_h, v, a_w,
                          precision=jax.lax.Precision.HIGHEST)

    mu1, mu2 = filt(x), filt(y)
    s1 = filt(x * x) - mu1 * mu1
    s2 = filt(y * y) - mu2 * mu2
    s12 = filt(x * y) - mu1 * mu2
    ssim_map = ((2 * mu1 * mu2 + C1) * (2 * s12 + C2)) / (
        (mu1 * mu1 + mu2 * mu2 + C1) * (s1 + s2 + C2))
    d = x - y
    ad = jnp.abs(d)
    sl1 = jnp.mean(jnp.where(ad < 1.0, 0.5 * d * d, ad - 0.5))
    return alpha * (1.0 - jnp.mean(ssim_map)) + (1.0 - alpha) * sl1


if __name__ == "__main__":
    key = jax.random.PRNGKey(0)
    k1, k2 = jax.random.split(key)
    # Depth-image style inputs: N=2, C=1, 16x16, values in [0, 1) (data_range=1.0).
    img1 = jax.random.uniform(k1, (2, 1, 16, 16), dtype=jnp.float32)
    img2 = jax.random.uniform(k2, (2, 1, 16, 16), dtype=jnp.float32)

    loss = combined_loss(img1, img2, alpha=0.8)
    jax.block_until_ready(loss)

    ref = _combined_loss_ref(img1, img2, alpha=0.8)
    np.testing.assert_allclose(np.asarray(loss), np.asarray(ref),
                               rtol=5e-3, atol=5e-3)
    print("KERNEL_OK")
</pallas_src>

<mosaic_0001>
module attributes {stable_mosaic.version = 11 : i64} {
  func.func @_combined_loss_kernel(%arg0: i32, %arg1: memref<256x128xf32, #tpu.memory_space<vmem>>, %arg2: memref<256x128xf32, #tpu.memory_space<vmem>>, %arg3: memref<36x256xbf16, #tpu.memory_space<vmem>>, %arg4: memref<2x128xf32, #tpu.memory_space<vmem>>, %arg5: memref<256x640xbf16, #tpu.memory_space<vmem>>) attributes {dimension_semantics = [#tpu.dimension_semantics<parallel>], iteration_bounds = array<i64: 1>, scalar_prefetch = 0 : i64, scratch_operands = 1 : i64, tpu.core_type = #tpu.core_type<tc>, window_params = [{transform_indices = @transform_0, window_bounds = array<i64: 256, 128>}, {transform_indices = @transform_1, window_bounds = array<i64: 256, 128>}, {pipeline_mode = #tpu.pipeline_mode<synchronous>, transform_indices = @transform_2, window_bounds = array<i64: 36, 256>}, {transform_indices = @transform_3, window_bounds = array<i64: 2, 128>}]} {
    %c0 = arith.constant 0 : index
    %c0_0 = arith.constant 0 : index
    %0 = vector.load %arg1[%c0, %c0_0] : memref<256x128xf32, #tpu.memory_space<vmem>>, vector<256x128xf32>
    %c0_1 = arith.constant 0 : index
    %c0_2 = arith.constant 0 : index
    %1 = vector.load %arg2[%c0_1, %c0_2] : memref<256x128xf32, #tpu.memory_space<vmem>>, vector<256x128xf32>
    %2 = arith.truncf %0 : vector<256x128xf32> to vector<256x128xbf16>
    %c0_3 = arith.constant 0 : index
    %c0_4 = arith.constant 0 : index
    %3 = vector.load %arg5[%c0_3, %c0_4] : memref<256x640xbf16, #tpu.memory_space<vmem>>, vector<256x128xbf16>
    tpu.vector_store %arg5[%c0_3, %c0_4], %2 {strides = array<i32>} : memref<256x640xbf16, #tpu.memory_space<vmem>>, vector<256x128xbf16>,
    %4 = arith.truncf %1 : vector<256x128xf32> to vector<256x128xbf16>
    %c0_5 = arith.constant 0 : index
    %c128 = arith.constant 128 : index
    %5 = vector.load %arg5[%c0_5, %c128] : memref<256x640xbf16, #tpu.memory_space<vmem>>, vector<256x128xbf16>
    tpu.vector_store %arg5[%c0_5, %c128], %4 {strides = array<i32>} : memref<256x640xbf16, #tpu.memory_space<vmem>>, vector<256x128xbf16>,
    %6 = arith.mulf %0, %0 : vector<256x128xf32>
    %7 = arith.truncf %6 : vector<256x128xf32> to vector<256x128xbf16>
    %c0_6 = arith.constant 0 : index
    %c256 = arith.constant 256 : index
    %8 = vector.load %arg5[%c0_6, %c256] : memref<256x640xbf16, #tpu.memory_space<vmem>>, vector<256x128xbf16>
    tpu.vector_store %arg5[%c0_6, %c256], %7 {strides = array<i32>} : memref<256x640xbf16, #tpu.memory_space<vmem>>, vector<256x128xbf16>,
    %9 = arith.mulf %1, %1 : vector<256x128xf32>
    %10 = arith.truncf %9 : vector<256x128xf32> to vector<256x128xbf16>
    %c0_7 = arith.constant 0 : index
    %c384 = arith.constant 384 : index
    %11 = vector.load %arg5[%c0_7, %c384] : memref<256x640xbf16, #tpu.memory_space<vmem>>, vector<256x128xbf16>
    tpu.vector_store %arg5[%c0_7, %c384], %10 {strides = array<i32>} : memref<256x640xbf16, #tpu.memory_space<vmem>>, vector<256x128xbf16>,
    %12 = arith.mulf %0, %1 : vector<256x128xf32>
    %13 = arith.truncf %12 : vector<256x128xf32> to vector<256x128xbf16>
    %c0_8 = arith.constant 0 : index
    %c512 = arith.constant 512 : index
    %14 = vector.load %arg5[%c0_8, %c512] : memref<256x640xbf16, #tpu.memory_space<vmem>>, vector<256x128xbf16>
    tpu.vector_store %arg5[%c0_8, %c512], %13 {strides = array<i32>} : memref<256x640xbf16, #tpu.memory_space<vmem>>, vector<256x128xbf16>,
    %c0_9 = arith.constant 0 : index
    %c0_10 = arith.constant 0 : index
    %15 = vector.load %arg3[%c0_9, %c0_10] : memref<36x256xbf16, #tpu.memory_space<vmem>>, vector<36x256xbf16>
    %c0_11 = arith.constant 0 : index
    %c0_12 = arith.constant 0 : index
    %16 = vector.load %arg5[%c0_11, %c0_12] : memref<256x640xbf16, #tpu.memory_space<vmem>>, vector<256x640xbf16>
    %cst = arith.constant dense<0.000000e+00> : vector<36x640xf32>
    %17 = tpu.matmul %15, %16, %cst {dimension_numbers = #tpu.dot_dimension_numbers<[1], [0], [0], [1], [0, 0, 1, 1], [], []>} : vector<36x256xbf16>, vector<256x640xbf16>, vector<36x640xf32> -> vector<36x640xf32>
    %18 = vector.extract_strided_slice %17 {offsets = [0, 0], sizes = [36, 128], strides = [1, 1]} : vector<36x640xf32> to vector<36x128xf32>
    %19 = vector.extract_strided_slice %17 {offsets = [0, 128], sizes = [36, 128], strides = [1, 1]} : vector<36x640xf32> to vector<36x128xf32>
    %20 = vector.extract_strided_slice %17 {offsets = [0, 256], sizes = [36, 128], strides = [1, 1]} : vector<36x640xf32> to vector<36x128xf32>
    %21 = vector.extract_strided_slice %17 {offsets = [0, 384], sizes = [36, 128], strides = [1, 1]} : vector<36x640xf32> to vector<36x128xf32>
    %22 = vector.extract_strided_slice %17 {offsets = [0, 512], sizes = [36, 128], strides = [1, 1]} : vector<36x640xf32> to vector<36x128xf32>
    %23 = arith.mulf %18, %18 : vector<36x128xf32>
    %24 = arith.mulf %19, %19 : vector<36x128xf32>
    %25 = arith.mulf %18, %19 : vector<36x128xf32>
    %26 = arith.subf %20, %23 : vector<36x128xf32>
    %27 = arith.subf %21, %24 : vector<36x128xf32>
    %28 = arith.subf %22, %25 : vector<36x128xf32>
    %cst_13 = arith.constant 2.000000e+00 : f32
    %29 = vector.broadcast %cst_13 : f32 to vector<36x128xf32>
    %30 = arith.mulf %29, %25 : vector<36x128xf32>
    %cst_14 = arith.constant 9.99999974E-5 : f32
    %31 = vector.broadcast %cst_14 : f32 to vector<36x128xf32>
    %32 = arith.addf %30, %31 : vector<36x128xf32>
    %cst_15 = arith.constant 2.000000e+00 : f32
    %33 = vector.broadcast %cst_15 : f32 to vector<36x128xf32>
    %34 = arith.mulf %33, %28 : vector<36x128xf32>
    %cst_16 = arith.constant 8.99999984E-4 : f32
    %35 = vector.broadcast %cst_16 : f32 to vector<36x128xf32>
    %36 = arith.addf %34, %35 : vector<36x128xf32>
    %37 = arith.mulf %32, %36 : vector<36x128xf32>
    %38 = arith.addf %23, %24 : vector<36x128xf32>
    %cst_17 = arith.constant 9.99999974E-5 : f32
    %39 = vector.broadcast %cst_17 : f32 to vector<36x128xf32>
    %40 = arith.addf %38, %39 : vector<36x128xf32>
    %41 = arith.addf %26, %27 : vector<36x128xf32>
    %cst_18 = arith.constant 8.99999984E-4 : f32
    %42 = vector.broadcast %cst_18 : f32 to vector<36x128xf32>
    %43 = arith.addf %41, %42 : vector<36x128xf32>
    %44 = arith.mulf %40, %43 : vector<36x128xf32>
    %45 = tpu.reciprocal %44 {approx = true} : vector<36x128xf32> -> vector<36x128xf32>
    %46 = arith.mulf %37, %45 : vector<36x128xf32>
    %47 = arith.subf %0, %1 : vector<256x128xf32>
    %48 = math.absf %47 : vector<256x128xf32>
    %cst_19 = arith.constant 1.000000e+00 : f32
    %49 = vector.broadcast %cst_19 : f32 to vector<256x128xf32>
    %50 = arith.cmpf olt, %48, %49 : vector<256x128xf32>
    %cst_20 = arith.constant 5.000000e-01 : f32
    %51 = vector.broadcast %cst_20 : f32 to vector<256x128xf32>
    %52 = arith.mulf %51, %47 : vector<256x128xf32>
    %53 = arith.mulf %52, %47 : vector<256x128xf32>
    %cst_21 = arith.constant 5.000000e-01 : f32
    %54 = vector.broadcast %cst_21 : f32 to vector<256x128xf32>
    %55 = arith.subf %48, %54 : vector<256x128xf32>
    %56 = arith.select %50, %53, %55 : vector<256x128xi1>, vector<256x128xf32>
    %cst_22 = arith.constant dense<0.000000e+00> : vector<128xf32>
    %57 = vector.multi_reduction <add>, %46, %cst_22 [0] : vector<36x128xf32> to vector<128xf32>
    %58 = vector.shape_cast %57 : vector<128xf32> to vector<1x128xf32>
    %cst_23 = arith.constant dense<0.000000e+00> : vector<128xf32>
    %59 = vector.multi_reduction <add>, %56, %cst_23 [0] : vector<256x128xf32> to vector<128xf32>
    %60 = vector.shape_cast %59 : vector<128xf32> to vector<1x128xf32>
    %61 = tpu.concatenate %58, %60 in 0 : vector<1x128xf32>, vector<1x128xf32> -> vector<2x128xf32>
    %c0_24 = arith.constant 0 : index
    %c0_25 = arith.constant 0 : index
    %62 = vector.load %arg4[%c0_24, %c0_25] : memref<2x128xf32, #tpu.memory_space<vmem>>, vector<2x128xf32>
    tpu.vector_store %arg4[%c0_24, %c0_25], %61 {strides = array<i32>} : memref<2x128xf32, #tpu.memory_space<vmem>>, vector<2x128xf32>,
    return
  }
  func.func @transform_0(%arg0: i32) -> (i32, i32) {
    %c0_i32 = arith.constant 0 : i32
    %c0_i32_0 = arith.constant 0 : i32
    return %c0_i32, %arg0 : i32, i32
  }
  func.func @transform_1(%arg0: i32) -> (i32, i32) {
    %c0_i32 = arith.constant 0 : i32
    %c0_i32_0 = arith.constant 0 : i32
    return %c0_i32, %arg0 : i32, i32
  }
  func.func @transform_2(%arg0: i32) -> (i32, i32) {
    %c0_i32 = arith.constant 0 : i32
    %c0_i32_0 = arith.constant 0 : i32
    %c0_i32_1 = arith.constant 0 : i32
    return %c0_i32, %c0_i32_0 : i32, i32
  }
  func.func @transform_3(%arg0: i32) -> (i32, i32) {
    %c0_i32 = arith.constant 0 : i32
    %c0_i32_0 = arith.constant 0 : i32
    return %c0_i32, %arg0 : i32, i32
  }
}

</mosaic_0001>

<bundles_post_ra>
// kernel: tpu_custom_call.1
= control target key start
LH: loop header
LB: loop body
LE: loop exit
PB: predicated region body
PF: predicated region fallthrough
CT: control target
= control target key end

     0   :  { %8 = vsyncpa [#allocation4], 0  ;;  %s2015_s0 = inlined_call_operand.hbm [shape: f32[256,128], index: 0, kind: input, shape index: {}]   ;;  %s2016_s1 = inlined_call_operand.hbm [shape: f32[256,128], index: 1, kind: input, shape index: {}]   ;;  %s2017_s2 = inlined_call_operand.hbm [shape: bf16[36,256], index: 2, kind: input, shape index: {}]   ;;  %s2018_s3 = inlined_call_operand.hbm [shape: f32[2,128], index: 3, kind: output, shape index: {}]  }
   0x1   :  { %9 = vsyncpa [#allocation7], 0 }
   0x2   :  { %10 = vsyncpa [#allocation5], 0  ;;  %s1255_s12 = smov [#allocation6]   ;;  %s1256_s14 = smov [#allocation3]  }
   0x3   :  { %s28_s13 = sshll.u32 %s1255_s12, 4  ;;  %s16_s15 = sshll.u32 %s1256_s14, 4  ;;  %s29_s13 = int_to_ptr.vmem [resolvable:$true] %s28_s13  ;;  %s1281_s15 = int_to_ptr.vmem [resolvable:$true] %s16_s15 }
   0x4   :  { %s1161_s18 = scalar_lea.hbm %s2016_s1, 4096 }
   0x5   :  { %p1162_p0 = scmp.ne.s32.totalorder %s2016_s1, %s1161_s18  ;;  %p1165_p1 = scmp.lt.u32.totalorder %s1161_s18, %s2016_s1 }
   0x7   :  { %p1167_p2 = pnand %p1165_p1, %p1162_p0 }
   0x9   :  { %1170 = shalt.err (!%p1167_p2)
}
   0xa   :  { %s1171_s23 = scalar_lea.vmem %s29_s13, 4096  ;;  %p1176_p4 = scmp.lt.s32.totalorder %s29_s13, %s29_s13 }
   0xb   :  { %p1172_p3 = scmp.ne.s32.totalorder %s29_s13, %s1171_s23  ;;  %p1177_p5 = scmp.lt.s32.totalorder %s1171_s23, %s1171_s23 }
   0xd   :  { %p1178_p6 = por %p1177_p5, %p1176_p4 }
   0xf   :  { %p1179_p7 = pnand %p1178_p6, %p1172_p3 }
  0x11   :  { %1182 = shalt.err (!%p1179_p7)
}
  0x12   :  { %s1257_s24 = smov 128   ;;  %s1258_s25 = smov 8  }
  0x13   :  { %34 = dma.hbm_to_vmem [thread:$0]  %s2016_s1, 4096, %s29_s13, [#allocation7], %s1257_s24, %s1257_s24, %s1258_s25  }
  0x14   :  { %s1183_s30 = scalar_lea.hbm %s2015_s0, 4096 }
  0x15   :  { %p1184_p8 = scmp.ne.s32.totalorder %s2015_s0, %s1183_s30  ;;  %p1187_p9 = scmp.lt.u32.totalorder %s1183_s30, %s2015_s0 }
  0x17   :  { %p1189_p10 = pnand %p1187_p9, %p1184_p8 }
  0x19   :  { %1192 = shalt.err (!%p1189_p10)
}
  0x1a   :  { %s1193_s8 = scalar_lea.vmem %s1281_s15, 4096  ;;  %p1198_p12 = scmp.lt.s32.totalorder %s1281_s15, %s1281_s15 }
  0x1b   :  { %p1194_p11 = scmp.ne.s32.totalorder %s1281_s15, %s1193_s8  ;;  %p1199_p13 = scmp.lt.s32.totalorder %s1193_s8, %s1193_s8 }
  0x1d   :  { %p1200_p0 = por %p1199_p13, %p1198_p12 }
  0x1f   :  { %p1201_p1 = pnand %p1200_p0, %p1194_p11 }
  0x21   :  { %1204 = shalt.err (!%p1201_p1)
}
  0x22   :  { %22 = dma.hbm_to_vmem [thread:$0]  %s2015_s0, 4096, %s1281_s15, [#allocation4], %s1257_s24, %s1257_s24, %s1258_s25  }
  0x23   :  { %s1259_s10 = smov [#allocation8]   ;;  %s1205_s14 = scalar_lea.hbm %s2017_s2, 640 }
  0x24   :  { %s40_s11 = sshll.u32 %s1259_s10, 4  ;;  %p1206_p2 = scmp.ne.s32.totalorder %s2017_s2, %s1205_s14  ;;  %s41_s11 = int_to_ptr.vmem [resolvable:$true] %s40_s11 }
  0x25   :  { %p1209_p3 = scmp.lt.u32.totalorder %s1205_s14, %s2017_s2 }
  0x27   :  { %p1211_p4 = pnand %p1209_p3, %p1206_p2 }
  0x29   :  { %1214 = shalt.err (!%p1211_p4)
}
  0x2a   :  { %s1215_s20 = scalar_lea.vmem %s41_s11, 640  ;;  %p1220_p6 = scmp.lt.s32.totalorder %s41_s11, %s41_s11 }
  0x2b   :  { %p1216_p5 = scmp.ne.s32.totalorder %s41_s11, %s1215_s20  ;;  %p1221_p7 = scmp.lt.s32.totalorder %s1215_s20, %s1215_s20 }
  0x2d   :  { %p1222_p8 = por %p1221_p7, %p1220_p6 }
  0x2f   :  { %p1223_p9 = pnand %p1222_p8, %p1216_p5 }
  0x31   :  { %1226 = shalt.err (!%p1223_p9)
}
  0x32   :  { %46 = dma.hbm_to_vmem [thread:$0]  %s2017_s2, 640, %s41_s11, [#allocation7], %s1257_s24, %s1257_s24, %s1258_s25  }
  0x33   :  { %1249 = dma.done.wait [#allocation4], 4096  }
  0x34   :  { %1250 = vsyncadd [#allocation4], 4294963200 }
  0x35   :  { %1251 = dma.done.wait [#allocation7], 4736  }
  0x36   :  { %1252 = vsyncadd [#allocation7], 4294962560  ;;  %v1333_v0 = vld [vmem:[#allocation6] sm:$0xff]  ;;  %v1335_v1 = vld [vmem:[#allocation6 + $0x8] sm:$0xff]  ;;  %s1260_s2 = smov [#allocation9]  }
  0x37   :  { %v1337_v2 = vld [vmem:[#allocation3] sm:$0xff]  ;;  %v153_v3 = vpack.c.bf16 %v1335_v1, %v1333_v0  ;;  %v1341_v4 = vld [vmem:[#allocation3 + $0x8] sm:$0xff]  ;;  %v249_v6 = vmul.f32 %v1333_v0, %v1333_v0  ;;  %v250_v7 = vmul.f32 %v1335_v1, %v1335_v1  ;;  %v1349_v8 = vld [vmem:[#allocation6 + $0x10] sm:$0xff]  ;;  %s1039_s21 = sshll.u32 %s1260_s2, 4  ;;  %s1040_s21 = int_to_ptr.vmem [resolvable:$true] %s1039_s21 }
  0x38   :  { %v757_v5 = vsub.f32 %v1337_v2, %v1333_v0  ;;  %v1351_v9 = vld [vmem:[#allocation6 + $0x18] sm:$0xff]  ;;  %v121_v10 = vpack.c.bf16 %v1341_v4, %v1337_v2  ;;  %v758_v11 = vsub.f32 %v1341_v4, %v1335_v1  ;;  %v185_v12 = vmul.f32 %v1337_v2, %v1337_v2  ;;  %v1361_v14 = vld [vmem:[#allocation3 + $0x10] sm:$0xff]  ;;  %v1389_v40 = vld [vmem:[#allocation6 + $0x20] sm:$0xff]  ;;  %s1227_s22 = scalar_lea.vmem %s1040_s21, 32  ;;  %p1232_p11 = scmp.lt.s32.totalorder %s1040_s21, %s1040_s21 }
  0x39   :  { %v186_v13 = vmul.f32 %v1341_v4, %v1341_v4  ;;  %v1363_v15 = vld [vmem:[#allocation3 + $0x18] sm:$0xff]  ;;  %489 = vmatprep.subr.bf16.mxu0 %v153_v3  ;;  %v281_v18 = vpack.c.bf16 %v250_v7, %v249_v6  ;;  %v154_v19 = vpack.c.bf16 %v1351_v9, %v1349_v8  ;;  %v759_v27 = vsub.f32 %v1361_v14, %v1349_v8  ;;  %v1391_v41 = vld [vmem:[#allocation6 + $0x28] sm:$0xff]  ;;  %v1393_v45 = vld [vmem:[#allocation3 + $0x20] sm:$0xff]  ;;  %p1228_p10 = scmp.ne.s32.totalorder %s1040_s21, %s1227_s22  ;;  %p1233_p12 = scmp.lt.s32.totalorder %s1227_s22, %s1227_s22 }
  0x3a   :  { %v789_v16 = vand.u32 2147483647, %v757_v5  ;;  %v853_v17 = vmul.f32 0.5, %v757_v5  ;;  %490 = vmatpush1.bf16.msra.mxu0 %v121_v10  ;;  %v790_v20 = vand.u32 2147483647, %v758_v11  ;;  %v854_v21 = vmul.f32 0.5, %v758_v11 }
  0x3b   :  { %v217_v22 = vpack.c.bf16 %v186_v13, %v185_v12  ;;  %v122_v23 = vpack.c.bf16 %v1363_v15, %v1361_v14  ;;  %550 = vmatprep.subr.bf16.mxu1 %v281_v18  ;;  %491 = vmatprep.subr.bf16.mxu0 %v154_v19  ;;  %v760_v31 = vsub.f32 %v1363_v15, %v1351_v9  ;;  %v791_v33 = vand.u32 2147483647, %v759_v27  ;;  %v1395_v46 = vld [vmem:[#allocation3 + $0x28] sm:$0xff]  ;;  %v1419_v63 = vld [vmem:[#allocation6 + $0x30] sm:$0xff]  ;;  %v1421_v3 = vld [vmem:[#allocation6 + $0x38] sm:$0xff]  ;;  %p1234_p13 = por %p1233_p12, %p1232_p11 }
  0x3c   :  { %vm1369_vm0 = vcmp.lt.f32.partialorder %v789_v16, 1.0  ;;  %v885_v25 = vmul.f32 %v853_v17, %v757_v5  ;;  %v1055_v26 = vadd.f32 -0.5, %v789_v16  ;;  %vm1375_vm1 = vcmp.lt.f32.partialorder %v790_v20, 1.0  ;;  %v1427_v17 = vld [vmem:[#allocation3 + $0x30] sm:$0xff]  ;;  %v1429_v18 = vld [vmem:[#allocation3 + $0x38] sm:$0xff] }
  0x3d   :  { %v886_v29 = vmul.f32 %v854_v21, %v758_v11  ;;  %v1056_v30 = vadd.f32 -0.5, %v790_v20  ;;  %551 = vmatpush1.bf16.msra.mxu1 %v217_v22  ;;  %v855_v34 = vmul.f32 0.5, %v759_v27  ;;  %v251_v35 = vmul.f32 %v1349_v8, %v1349_v8  ;;  %p1235_p0 = pnand %p1234_p13, %p1228_p10 }
  0x3e   :  { %v949_v32 = vsel %vm1369_vm0, %v885_v25, %v1055_v26  ;;  %492 = vmatpush1.bf16.msra.mxu0 %v122_v23  ;;  %v792_v37 = vand.u32 2147483647, %v760_v31  ;;  %v856_v38 = vmul.f32 0.5, %v760_v31  ;;  %v252_v39 = vmul.f32 %v1351_v9, %v1351_v9 }
  0x3f   :  { %v950_v36 = vsel %vm1375_vm1, %v886_v29, %v1056_v30  ;;  %vm823_vm2 = vcmp.lt.f32.partialorder %v791_v33, 1.0  ;;  %v887_v43 = vmul.f32 %v855_v34, %v759_v27  ;;  %v1057_v44 = vadd.f32 -0.5, %v791_v33  ;;  %v1449_v34 = vld [vmem:[#allocation6 + $0x40] sm:$0xff] }
  0x40   :  { %v993_v42 = vadd.f32 %v950_v36, %v949_v32  ;;  %vm1397_vm3 = vcmp.lt.f32.partialorder %v792_v37, 1.0  ;;  %v888_v48 = vmul.f32 %v856_v38, %v760_v31  ;;  %v1058_v49 = vadd.f32 -0.5, %v792_v37 }
  0x41   :  { %v282_v50 = vpack.c.bf16 %v252_v39, %v251_v35  ;;  %v951_v51 = vsel %vm823_vm2, %v887_v43, %v1057_v44  ;;  %v187_v52 = vmul.f32 %v1361_v14, %v1361_v14  ;;  %v188_v53 = vmul.f32 %v1363_v15, %v1363_v15  ;;  %v1451_v35 = vld [vmem:[#allocation6 + $0x48] sm:$0xff] }
  0x42   :  { %v155_v54 = vpack.c.bf16 %v1391_v41, %v1389_v40  ;;  %v952_v55 = vsel %vm1397_vm3, %v888_v48, %v1058_v49  ;;  %v994_v56 = vadd.f32 %v993_v42, %v951_v51  ;;  %v123_v57 = vpack.c.bf16 %v1395_v46, %v1393_v45  ;;  %2046 = vst [vmem:[#allocation13_spill] sm:$0xff] %v1451_v35  ;;  %v1457_v48 = vld [vmem:[#allocation3 + $0x40] sm:$0xff]  ;;  %v1459_v49 = vld [vmem:[#allocation3 + $0x48] sm:$0xff] }
  0x43   :  { %552 = vmatprep.subr.bf16.mxu1 %v282_v50  ;;  %v761_v58 = vsub.f32 %v1393_v45, %v1389_v40  ;;  %v218_v59 = vpack.c.bf16 %v188_v53, %v187_v52  ;;  %v762_v60 = vsub.f32 %v1395_v46, %v1391_v41  ;;  %v253_v61 = vmul.f32 %v1389_v40, %v1389_v40 }
  0x44   :  { %493 = vmatprep.subr.bf16.mxu0 %v155_v54  ;;  %v254_v62 = vmul.f32 %v1391_v41, %v1391_v41  ;;  %v995_v5 = vadd.f32 %v994_v56, %v952_v55  ;;  %v189_v10 = vmul.f32 %v1393_v45, %v1393_v45  ;;  %v190_v16 = vmul.f32 %v1395_v46, %v1395_v46 }
  0x45   :  { %494 = vmatpush1.bf16.msra.mxu0 %v123_v57  ;;  %v793_v6 = vand.u32 2147483647, %v761_v58  ;;  %v857_v7 = vmul.f32 0.5, %v761_v58  ;;  %553 = vmatpush1.bf16.msra.mxu1 %v218_v59  ;;  %v794_v11 = vand.u32 2147483647, %v762_v60  ;;  %v858_v12 = vmul.f32 0.5, %v762_v60 }
  0x46   :  { %v283_v13 = vpack.c.bf16 %v254_v62, %v253_v61  ;;  %v156_v21 = vpack.c.bf16 %v1421_v3, %v1419_v63  ;;  %v219_v25 = vpack.c.bf16 %v190_v16, %v189_v10  ;;  %v124_v27 = vpack.c.bf16 %v1429_v18, %v1427_v17  ;;  %v1487_v16 = vld [vmem:[#allocation6 + $0x50] sm:$0xff] }
  0x47   :  { %vm825_vm4 = vcmp.lt.f32.partialorder %v793_v6, 1.0  ;;  %v889_v19 = vmul.f32 %v857_v7, %v761_v58  ;;  %v1059_v20 = vadd.f32 -0.5, %v793_v6  ;;  %vm1433_vm5 = vcmp.lt.f32.partialorder %v794_v11, 1.0  ;;  %v1471_v58 = vld [vmem:[#allocation8 + $0x4] ss:$8 sps:$4 sm:$0xff]   ;;  %2052 = vst [vmem:[#allocation15_spill] sm:$0xff] %v1487_v16 }
  0x48   :  { %v890_v23 = vmul.f32 %v858_v12, %v762_v60  ;;  %v1060_v24 = vadd.f32 -0.5, %v794_v11  ;;  %554 = vmatprep.subr.bf16.mxu1 %v283_v13  ;;  %495 = vmatprep.subr.bf16.mxu0 %v156_v21  ;;  %v763_v28 = vsub.f32 %v1427_v17, %v1419_v63  ;;  %v764_v29 = vsub.f32 %v1429_v18, %v1421_v3 }
  0x49   :  { %v953_v26 = vsel %vm825_vm4, %v889_v19, %v1059_v20  ;;  %555 = vmatpush1.bf16.msra.mxu1 %v219_v25  ;;  %v255_v32 = vmul.f32 %v1419_v63, %v1419_v63  ;;  %v256_v33 = vmul.f32 %v1421_v3, %v1421_v3  ;;  %496 = vmatpush1.bf16.msra.mxu0 %v124_v27  ;;  %v1498_v25 = vld [vmem:[#allocation3 + $0x58] sm:$0xff] }
  0x4a   :  { %v954_v30 = vsel %vm1433_vm5, %v890_v23, %v1060_v24  ;;  %v996_v31 = vadd.f32 %v995_v5, %v953_v26  ;;  %v795_v36 = vand.u32 2147483647, %v763_v28  ;;  %v796_v37 = vand.u32 2147483647, %v764_v29  ;;  %2051 = vst [vmem:[#allocation14_spill] sm:$0xff] %v1471_v58  ;;  %521 = vmatprep.mubr.bf16.mxu0 %v1471_v58  ;;  %v1494_v23 = vld [vmem:[#allocation6 + $0x58] sm:$0xff]  ;;  %582 = vmatprep.mubr.bf16.mxu1 %v1471_v58 }
  0x4b   :  { %v859_v38 = vmul.f32 0.5, %v763_v28  ;;  %v860_v39 = vmul.f32 0.5, %v764_v29  ;;  %v284_v43 = vpack.c.bf16 %v256_v33, %v255_v32  ;;  %v191_v44 = vmul.f32 %v1427_v17, %v1427_v17  ;;  %2053 = vst [vmem:[#allocation16_spill] sm:$0xff] %v1494_v23  ;;  %v1496_v24 = vld [vmem:[#allocation3 + $0x50] sm:$0xff]  ;;  %2055 = vst [vmem:[#allocation18_spill] sm:$0xff] %v1498_v25 }
  0x4c   :  { %v997_v42 = vadd.f32 %v996_v31, %v954_v30  ;;  %v192_v47 = vmul.f32 %v1429_v18, %v1429_v18  ;;  %vm1461_vm6 = vcmp.lt.f32.partialorder %v795_v36, 1.0  ;;  %vm1465_vm7 = vcmp.lt.f32.partialorder %v796_v37, 1.0  ;;  %2054 = vst [vmem:[#allocation17_spill] sm:$0xff] %v1496_v24 }
  0x4d   :  { %v891_v52 = vmul.f32 %v859_v38, %v763_v28  ;;  %v892_v53 = vmul.f32 %v860_v39, %v764_v29  ;;  %v1061_v54 = vadd.f32 -0.5, %v795_v36  ;;  %v1062_v55 = vadd.f32 -0.5, %v796_v37  ;;  %556 = vmatprep.subr.bf16.mxu1 %v284_v43 }
  0x4e   :  { %v220_v56 = vpack.c.bf16 %v192_v47, %v191_v44  ;;  %v157_v57 = vpack.c.bf16 %v1451_v35, %v1449_v34  ;;  %v125_v59 = vpack.c.bf16 %v1459_v49, %v1457_v48  ;;  %v765_v60 = vsub.f32 %v1457_v48, %v1449_v34 }
  0x4f   :  { %v766_v61 = vsub.f32 %v1459_v49, %v1451_v35  ;;  %v257_v62 = vmul.f32 %v1449_v34, %v1449_v34  ;;  %v955_v5 = vsel %vm1461_vm6, %v891_v52, %v1061_v54  ;;  %v956_v6 = vsel %vm1465_vm7, %v892_v53, %v1062_v55  ;;  %v1525_v54 = vld [vmem:[#allocation6 + $0x60] sm:$0xff] }
  0x50   :  { %557 = vmatpush1.bf16.msra.mxu1 %v220_v56  ;;  %497 = vmatprep.subr.bf16.mxu0 %v157_v57  ;;  %v258_v7 = vmul.f32 %v1451_v35, %v1451_v35  ;;  %v998_v10 = vadd.f32 %v997_v42, %v955_v5  ;;  %v797_v11 = vand.u32 2147483647, %v765_v60  ;;  %v861_v13 = vmul.f32 0.5, %v765_v60  ;;  %2060 = vst [vmem:[#allocation19_spill] sm:$0xff] %v1525_v54 }
  0x51   :  { %498 = vmatpush1.bf16.msra.mxu0 %v125_v59  ;;  %v798_v12 = vand.u32 2147483647, %v766_v61  ;;  %v862_v19 = vmul.f32 0.5, %v766_v61  ;;  %v193_v21 = vmul.f32 %v1457_v48, %v1457_v48  ;;  %v194_v22 = vmul.f32 %v1459_v49, %v1459_v49 }
  0x52   :  { %v285_v20 = vpack.c.bf16 %v258_v7, %v257_v62  ;;  %v999_v26 = vadd.f32 %v998_v10, %v956_v6  ;;  %vm1501_vm8 = vcmp.lt.f32.partialorder %v797_v11, 1.0  ;;  %v893_v29 = vmul.f32 %v861_v13, %v765_v60  ;;  %v1531_v60 = vld [vmem:[#allocation6 + $0x68] sm:$0xff] }
  0x53   :  { %vm1505_vm9 = vcmp.lt.f32.partialorder %v798_v12, 1.0  ;;  %v894_v30 = vmul.f32 %v862_v19, %v766_v61  ;;  %v1063_v31 = vadd.f32 -0.5, %v797_v11  ;;  %v1064_v32 = vadd.f32 -0.5, %v798_v12  ;;  %2061 = vst [vmem:[#allocation20_spill] sm:$0xff] %v1531_v60  ;;  %v1533_v61 = vld [vmem:[#allocation3 + $0x60] sm:$0xff]  ;;  %v1535_v62 = vld [vmem:[#allocation3 + $0x68] sm:$0xff] }
  0x54   :  { %558 = vmatprep.subr.bf16.mxu1 %v285_v20  ;;  %v221_v33 = vpack.c.bf16 %v194_v22, %v193_v21  ;;  %v158_v36 = vpack.c.bf16 %v1494_v23, %v1487_v16  ;;  %v126_v37 = vpack.c.bf16 %v1498_v25, %v1496_v24  ;;  %v767_v38 = vsub.f32 %v1496_v24, %v1487_v16 }
  0x55   :  { %v768_v39 = vsub.f32 %v1498_v25, %v1494_v23  ;;  %v957_v42 = vsel %vm1501_vm8, %v893_v29, %v1063_v31  ;;  %v958_v43 = vsel %vm1505_vm9, %v894_v30, %v1064_v32  ;;  %v259_v44 = vmul.f32 %v1487_v16, %v1487_v16  ;;  %2062 = vst [vmem:[#allocation21_spill] sm:$0xff] %v1533_v61 }
  0x56   :  { %559 = vmatpush1.bf16.msra.mxu1 %v221_v33  ;;  %v260_v47 = vmul.f32 %v1494_v23, %v1494_v23  ;;  %v1000_v50 = vadd.f32 %v999_v26, %v957_v42  ;;  %499 = vmatprep.subr.bf16.mxu0 %v158_v36  ;;  %v799_v51 = vand.u32 2147483647, %v767_v38  ;;  %v863_v53 = vmul.f32 0.5, %v767_v38  ;;  %2063 = vst [vmem:[#allocation22_spill] sm:$0xff] %v1535_v62 }
  0x57   :  { %v800_v52 = vand.u32 2147483647, %v768_v39  ;;  %500 = vmatpush1.bf16.msra.mxu0 %v126_v37  ;;  %v864_v55 = vmul.f32 0.5, %v768_v39  ;;  %v195_v57 = vmul.f32 %v1496_v24, %v1496_v24  ;;  %v196_v59 = vmul.f32 %v1498_v25, %v1498_v25  ;;  %v1561_v37 = vld [vmem:[#allocation6 + $0x70] sm:$0xff] }
  0x58   :  { %v286_v56 = vpack.c.bf16 %v260_v47, %v259_v44  ;;  %v1001_v5 = vadd.f32 %v1000_v50, %v958_v43  ;;  %vm1537_vm10 = vcmp.lt.f32.partialorder %v799_v51, 1.0  ;;  %v895_v10 = vmul.f32 %v863_v53, %v767_v38  ;;  %2068 = vst [vmem:[#allocation23_spill] sm:$0xff] %v1561_v37  ;;  %v1567_v44 = vld [vmem:[#allocation6 + $0x78] sm:$0xff]  ;;  %v1569_v47 = vld [vmem:[#allocation3 + $0x70] sm:$0xff] }
  0x59   :  { %vm1541_vm11 = vcmp.lt.f32.partialorder %v800_v52, 1.0  ;;  %v896_v11 = vmul.f32 %v864_v55, %v768_v39  ;;  %v1065_v12 = vadd.f32 -0.5, %v799_v51  ;;  %v1066_v13 = vadd.f32 -0.5, %v800_v52  ;;  %2069 = vst [vmem:[#allocation24_spill] sm:$0xff] %v1567_v44  ;;  %2070 = vst [vmem:[#allocation25_spill] sm:$0xff] %v1569_v47  ;;  %v1571_v50 = vld [vmem:[#allocation3 + $0x78] sm:$0xff] }
  0x5a   :  { %560 = vmatprep.subr.bf16.mxu1 %v286_v56  ;;  %v222_v19 = vpack.c.bf16 %v196_v59, %v195_v57  ;;  %v159_v20 = vpack.c.bf16 %v1531_v60, %v1525_v54  ;;  %v127_v21 = vpack.c.bf16 %v1535_v62, %v1533_v61  ;;  %v769_v22 = vsub.f32 %v1533_v61, %v1525_v54 }
  0x5b   :  { %v770_v26 = vsub.f32 %v1535_v62, %v1531_v60  ;;  %v959_v27 = vsel %vm1537_vm10, %v895_v10, %v1065_v12  ;;  %v960_v28 = vsel %vm1541_vm11, %v896_v11, %v1066_v13  ;;  %v261_v29 = vmul.f32 %v1525_v54, %v1525_v54  ;;  %2071 = vst [vmem:[#allocation26_spill] sm:$0xff] %v1571_v50 }
  0x5c   :  { %561 = vmatpush1.bf16.msra.mxu1 %v222_v19  ;;  %v262_v30 = vmul.f32 %v1531_v60, %v1531_v60  ;;  %v1002_v31 = vadd.f32 %v1001_v5, %v959_v27  ;;  %501 = vmatprep.subr.bf16.mxu0 %v159_v20  ;;  %v801_v32 = vand.u32 2147483647, %v769_v22  ;;  %v865_v36 = vmul.f32 0.5, %v769_v22 }
  0x5d   :  { %v802_v33 = vand.u32 2147483647, %v770_v26  ;;  %502 = vmatpush1.bf16.msra.mxu0 %v127_v21  ;;  %v866_v38 = vmul.f32 0.5, %v770_v26  ;;  %v197_v42 = vmul.f32 %v1533_v61, %v1533_v61  ;;  %v198_v43 = vmul.f32 %v1535_v62, %v1535_v62 }
  0x5e   :  { %v287_v39 = vpack.c.bf16 %v262_v30, %v261_v29  ;;  %v1003_v51 = vadd.f32 %v1002_v31, %v960_v28  ;;  %vm1573_vm12 = vcmp.lt.f32.partialorder %v801_v32, 1.0  ;;  %v897_v55 = vmul.f32 %v865_v36, %v769_v22  ;;  %v1597_v28 = vld [vmem:[#allocation6 + $0x80] sm:$0xff] }
  0x5f   :  { %vm1577_vm13 = vcmp.lt.f32.partialorder %v802_v33, 1.0  ;;  %v898_v56 = vmul.f32 %v866_v38, %v770_v26  ;;  %v1067_v57 = vadd.f32 -0.5, %v801_v32  ;;  %v1068_v59 = vadd.f32 -0.5, %v802_v33  ;;  %v1603_v33 = vld [vmem:[#allocation6 + $0x88] sm:$0xff]  ;;  %v1605_v36 = vld [vmem:[#allocation3 + $0x80] sm:$0xff] }
  0x60   :  { %562 = vmatprep.subr.bf16.mxu1 %v287_v39  ;;  %v223_v5 = vpack.c.bf16 %v198_v43, %v197_v42  ;;  %v160_v6 = vpack.c.bf16 %v1567_v44, %v1561_v37  ;;  %v128_v7 = vpack.c.bf16 %v1571_v50, %v1569_v47  ;;  %v771_v10 = vsub.f32 %v1569_v47, %v1561_v37  ;;  %v1607_v38 = vld [vmem:[#allocation3 + $0x88] sm:$0xff] }
  0x61   :  { %v772_v11 = vsub.f32 %v1571_v50, %v1567_v44  ;;  %v961_v12 = vsel %vm1573_vm12, %v897_v55, %v1067_v57  ;;  %v962_v13 = vsel %vm1577_vm13, %v898_v56, %v1068_v59  ;;  %v263_v19 = vmul.f32 %v1561_v37, %v1561_v37 }
  0x62   :  { %563 = vmatpush1.bf16.msra.mxu1 %v223_v5  ;;  %v264_v20 = vmul.f32 %v1567_v44, %v1567_v44  ;;  %v1004_v21 = vadd.f32 %v1003_v51, %v961_v12  ;;  %503 = vmatprep.subr.bf16.mxu0 %v160_v6  ;;  %v803_v22 = vand.u32 2147483647, %v771_v10  ;;  %v867_v27 = vmul.f32 0.5, %v771_v10 }
  0x63   :  { %v804_v26 = vand.u32 2147483647, %v772_v11  ;;  %504 = vmatpush1.bf16.msra.mxu0 %v128_v7  ;;  %v868_v29 = vmul.f32 0.5, %v772_v11  ;;  %v199_v31 = vmul.f32 %v1569_v47, %v1569_v47  ;;  %v200_v32 = vmul.f32 %v1571_v50, %v1571_v50 }
  0x64   :  { %v288_v30 = vpack.c.bf16 %v264_v20, %v263_v19  ;;  %v1005_v39 = vadd.f32 %v1004_v21, %v962_v13  ;;  %vm1609_vm14 = vcmp.lt.f32.partialorder %v803_v22, 1.0  ;;  %v899_v51 = vmul.f32 %v867_v27, %v771_v10 }
  0x65   :  { %vm1613_vm15 = vcmp.lt.f32.partialorder %v804_v26, 1.0  ;;  %v900_v52 = vmul.f32 %v868_v29, %v772_v11  ;;  %v1069_v53 = vadd.f32 -0.5, %v803_v22  ;;  %v1070_v55 = vadd.f32 -0.5, %v804_v26  ;;  %v1633_v22 = vld [vmem:[#allocation6 + $0x90] sm:$0xff] }
  0x66   :  { %564 = vmatprep.subr.bf16.mxu1 %v288_v30  ;;  %v224_v56 = vpack.c.bf16 %v200_v32, %v199_v31  ;;  %v161_v57 = vpack.c.bf16 %v1603_v33, %v1597_v28  ;;  %v129_v59 = vpack.c.bf16 %v1607_v38, %v1605_v36  ;;  %v773_v5 = vsub.f32 %v1605_v36, %v1597_v28  ;;  %v1639_v31 = vld [vmem:[#allocation6 + $0x98] sm:$0xff]  ;;  %v1641_v32 = vld [vmem:[#allocation3 + $0x90] sm:$0xff] }
  0x67   :  { %v774_v6 = vsub.f32 %v1607_v38, %v1603_v33  ;;  %v963_v7 = vsel %vm1609_vm14, %v899_v51, %v1069_v53  ;;  %v964_v10 = vsel %vm1613_vm15, %v900_v52, %v1070_v55  ;;  %v265_v11 = vmul.f32 %v1597_v28, %v1597_v28 }
  0x68   :  { %565 = vmatpush1.bf16.msra.mxu1 %v224_v56  ;;  %v266_v12 = vmul.f32 %v1603_v33, %v1603_v33  ;;  %v1006_v13 = vadd.f32 %v1005_v39, %v963_v7  ;;  %505 = vmatprep.subr.bf16.mxu0 %v161_v57  ;;  %v805_v19 = vand.u32 2147483647, %v773_v5  ;;  %v869_v21 = vmul.f32 0.5, %v773_v5  ;;  %v1643_v39 = vld [vmem:[#allocation3 + $0x98] sm:$0xff] }
  0x69   :  { %v806_v20 = vand.u32 2147483647, %v774_v6  ;;  %506 = vmatpush1.bf16.msra.mxu0 %v129_v59  ;;  %v870_v26 = vmul.f32 0.5, %v774_v6  ;;  %v201_v29 = vmul.f32 %v1605_v36, %v1605_v36  ;;  %v202_v30 = vmul.f32 %v1607_v38, %v1607_v38 }
  0x6a   :  { %v289_v27 = vpack.c.bf16 %v266_v12, %v265_v11  ;;  %v1007_v42 = vadd.f32 %v1006_v13, %v964_v10  ;;  %vm1645_vm0 = vcmp.lt.f32.partialorder %v805_v19, 1.0  ;;  %v901_v52 = vmul.f32 %v869_v21, %v773_v5 }
  0x6b   :  { %vm1649_vm1 = vcmp.lt.f32.partialorder %v806_v20, 1.0  ;;  %v902_v53 = vmul.f32 %v870_v26, %v774_v6  ;;  %v1071_v55 = vadd.f32 -0.5, %v805_v19  ;;  %v1072_v56 = vadd.f32 -0.5, %v806_v20 }
  0x6c   :  { %566 = vmatprep.subr.bf16.mxu1 %v289_v27  ;;  %v225_v57 = vpack.c.bf16 %v202_v30, %v201_v29  ;;  %v162_v59 = vpack.c.bf16 %v1639_v31, %v1633_v22  ;;  %v130_v7 = vpack.c.bf16 %v1643_v39, %v1641_v32  ;;  %v775_v10 = vsub.f32 %v1641_v32, %v1633_v22  ;;  %v1669_v27 = vld [vmem:[#allocation6 + $0xa0] sm:$0xff] }
  0x6d   :  { %v776_v11 = vsub.f32 %v1643_v39, %v1639_v31  ;;  %v965_v5 = vsel %vm1645_vm0, %v901_v52, %v1071_v55  ;;  %v966_v6 = vsel %vm1649_vm1, %v902_v53, %v1072_v56  ;;  %v267_v12 = vmul.f32 %v1633_v22, %v1633_v22  ;;  %v1675_v52 = vld [vmem:[#allocation6 + $0xa8] sm:$0xff]  ;;  %v1677_v53 = vld [vmem:[#allocation3 + $0xa0] sm:$0xff] }
  0x6e   :  { %567 = vmatpush1.bf16.msra.mxu1 %v225_v57  ;;  %v268_v13 = vmul.f32 %v1639_v31, %v1639_v31  ;;  %v1008_v19 = vadd.f32 %v1007_v42, %v965_v5  ;;  %507 = vmatprep.subr.bf16.mxu0 %v162_v59  ;;  %v807_v20 = vand.u32 2147483647, %v775_v10  ;;  %v871_v26 = vmul.f32 0.5, %v775_v10  ;;  %v1679_v42 = vld [vmem:[#allocation3 + $0xa8] sm:$0xff] }
  0x6f   :  { %v808_v21 = vand.u32 2147483647, %v776_v11  ;;  %508 = vmatpush1.bf16.msra.mxu0 %v130_v7  ;;  %v872_v29 = vmul.f32 0.5, %v776_v11  ;;  %v203_v43 = vmul.f32 %v1641_v32, %v1641_v32  ;;  %v204_v51 = vmul.f32 %v1643_v39, %v1643_v39 }
  0x70   :  { %v290_v30 = vpack.c.bf16 %v268_v13, %v267_v12  ;;  %v1009_v55 = vadd.f32 %v1008_v19, %v966_v6  ;;  %vm1681_vm2 = vcmp.lt.f32.partialorder %v807_v20, 1.0  ;;  %v903_v59 = vmul.f32 %v871_v26, %v775_v10 }
  0x71   :  { %vm1685_vm3 = vcmp.lt.f32.partialorder %v808_v21, 1.0  ;;  %v904_v7 = vmul.f32 %v872_v29, %v776_v11  ;;  %v1073_v5 = vadd.f32 -0.5, %v807_v20  ;;  %v1074_v12 = vadd.f32 -0.5, %v808_v21 }
  0x72   :  { %568 = vmatprep.subr.bf16.mxu1 %v290_v30  ;;  %v226_v13 = vpack.c.bf16 %v204_v51, %v203_v43  ;;  %v163_v44 = vpack.c.bf16 %v1675_v52, %v1669_v27  ;;  %v131_v6 = vpack.c.bf16 %v1679_v42, %v1677_v53  ;;  %v777_v19 = vsub.f32 %v1677_v53, %v1669_v27  ;;  %v1705_v51 = vld [vmem:[#allocation6 + $0xb0] sm:$0xff] }
  0x73   :  { %v778_v50 = vsub.f32 %v1679_v42, %v1675_v52  ;;  %v967_v10 = vsel %vm1681_vm2, %v903_v59, %v1073_v5  ;;  %v968_v11 = vsel %vm1685_vm3, %v904_v7, %v1074_v12  ;;  %v269_v20 = vmul.f32 %v1669_v27, %v1669_v27  ;;  %v1711_v5 = vld [vmem:[#allocation6 + $0xb8] sm:$0xff]  ;;  %v1713_v12 = vld [vmem:[#allocation3 + $0xb0] sm:$0xff] }
  0x74   :  { %569 = vmatpush1.bf16.msra.mxu1 %v226_v13  ;;  %v270_v21 = vmul.f32 %v1675_v52, %v1675_v52  ;;  %v1010_v26 = vadd.f32 %v1009_v55, %v967_v10  ;;  %509 = vmatprep.subr.bf16.mxu0 %v163_v44  ;;  %v809_v29 = vand.u32 2147483647, %v777_v19  ;;  %v873_v43 = vmul.f32 0.5, %v777_v19  ;;  %v1715_v55 = vld [vmem:[#allocation3 + $0xb8] sm:$0xff] }
  0x75   :  { %v810_v30 = vand.u32 2147483647, %v778_v50  ;;  %510 = vmatpush1.bf16.msra.mxu0 %v131_v6  ;;  %v874_v56 = vmul.f32 0.5, %v778_v50  ;;  %v205_v57 = vmul.f32 %v1677_v53, %v1677_v53  ;;  %v206_v7 = vmul.f32 %v1679_v42, %v1679_v42  ;;  %v1747_v6 = vld [vmem:[#allocation6 + $0xc8] sm:$0xff] }
  0x76   :  { %v291_v59 = vpack.c.bf16 %v270_v21, %v269_v20  ;;  %v1011_v44 = vadd.f32 %v1010_v26, %v968_v11  ;;  %vm1717_vm4 = vcmp.lt.f32.partialorder %v809_v29, 1.0  ;;  %v905_v10 = vmul.f32 %v873_v43, %v777_v19 }
  0x77   :  { %vm1721_vm5 = vcmp.lt.f32.partialorder %v810_v30, 1.0  ;;  %v906_v20 = vmul.f32 %v874_v56, %v778_v50  ;;  %v1075_v21 = vadd.f32 -0.5, %v809_v29  ;;  %v1076_v37 = vadd.f32 -0.5, %v810_v30 }
  0x78   :  { %570 = vmatprep.subr.bf16.mxu1 %v291_v59  ;;  %v227_v47 = vpack.c.bf16 %v206_v7, %v205_v57  ;;  %v164_v60 = vpack.c.bf16 %v1711_v5, %v1705_v51  ;;  %v132_v11 = vpack.c.bf16 %v1715_v55, %v1713_v12  ;;  %v779_v26 = vsub.f32 %v1713_v12, %v1705_v51  ;;  %v1741_v7 = vld [vmem:[#allocation6 + $0xc0] sm:$0xff] }
  0x79   :  { %v780_v62 = vsub.f32 %v1715_v55, %v1711_v5  ;;  %v969_v19 = vsel %vm1717_vm4, %v905_v10, %v1075_v21  ;;  %v970_v50 = vsel %vm1721_vm5, %v906_v20, %v1076_v37  ;;  %v271_v29 = vmul.f32 %v1705_v51, %v1705_v51  ;;  %v1749_v20 = vld [vmem:[#allocation3 + $0xc0] sm:$0xff] }
  0x7a   :  { %571 = vmatpush1.bf16.msra.mxu1 %v227_v47  ;;  %v272_v30 = vmul.f32 %v1711_v5, %v1711_v5  ;;  %v1012_v43 = vadd.f32 %v1011_v44, %v969_v19  ;;  %511 = vmatprep.subr.bf16.mxu0 %v164_v60  ;;  %v811_v56 = vand.u32 2147483647, %v779_v26  ;;  %v875_v57 = vmul.f32 0.5, %v779_v26  ;;  %v1751_v44 = vld [vmem:[#allocation3 + $0xc8] sm:$0xff] }
  0x7b   :  { %v812_v59 = vand.u32 2147483647, %v780_v62  ;;  %512 = vmatpush1.bf16.msra.mxu0 %v132_v11  ;;  %v876_v13 = vmul.f32 0.5, %v780_v62  ;;  %v207_v37 = vmul.f32 %v1713_v12, %v1713_v12  ;;  %v208_v47 = vmul.f32 %v1715_v55, %v1715_v55  ;;  %v1783_v11 = vld [vmem:[#allocation6 + $0xd8] sm:$0xff] }
  0x7c   :  { %v292_v10 = vpack.c.bf16 %v272_v30, %v271_v29  ;;  %v1013_v60 = vadd.f32 %v1012_v43, %v970_v50  ;;  %vm1753_vm6 = vcmp.lt.f32.partialorder %v811_v56, 1.0  ;;  %v907_v19 = vmul.f32 %v875_v57, %v779_v26 }
  0x7d   :  { %vm1757_vm7 = vcmp.lt.f32.partialorder %v812_v59, 1.0  ;;  %v908_v29 = vmul.f32 %v876_v13, %v780_v62  ;;  %v1077_v30 = vadd.f32 -0.5, %v811_v56  ;;  %v1078_v54 = vadd.f32 -0.5, %v812_v59 }
  0x7e   :  { %572 = vmatprep.subr.bf16.mxu1 %v292_v10  ;;  %v228_v61 = vpack.c.bf16 %v208_v47, %v207_v37  ;;  %v165_v58 = vpack.c.bf16 %v1747_v6, %v1741_v7  ;;  %v133_v50 = vpack.c.bf16 %v1751_v44, %v1749_v20  ;;  %v781_v43 = vsub.f32 %v1749_v20, %v1741_v7  ;;  %v1777_v47 = vld [vmem:[#allocation6 + $0xd0] sm:$0xff] }
  0x7f   :  { %v782_v23 = vsub.f32 %v1751_v44, %v1747_v6  ;;  %v971_v26 = vsel %vm1753_vm6, %v907_v19, %v1077_v30  ;;  %v972_v62 = vsel %vm1757_vm7, %v908_v29, %v1078_v54  ;;  %v273_v56 = vmul.f32 %v1741_v7, %v1741_v7  ;;  %v1785_v29 = vld [vmem:[#allocation3 + $0xd0] sm:$0xff] }
  0x80   :  { %573 = vmatpush1.bf16.msra.mxu1 %v228_v61  ;;  %v274_v59 = vmul.f32 %v1747_v6, %v1747_v6  ;;  %v1014_v57 = vadd.f32 %v1013_v60, %v971_v26  ;;  %513 = vmatprep.subr.bf16.mxu0 %v165_v58  ;;  %v813_v13 = vand.u32 2147483647, %v781_v43  ;;  %v877_v37 = vmul.f32 0.5, %v781_v43  ;;  %v1787_v60 = vld [vmem:[#allocation3 + $0xd8] sm:$0xff] }
  0x81   :  { %v814_v10 = vand.u32 2147483647, %v782_v23  ;;  %514 = vmatpush1.bf16.msra.mxu0 %v133_v50  ;;  %v878_v21 = vmul.f32 0.5, %v782_v23  ;;  %v209_v54 = vmul.f32 %v1749_v20, %v1749_v20  ;;  %v210_v61 = vmul.f32 %v1751_v44, %v1751_v44  ;;  %v1823_v50 = vld [vmem:[#allocation3 + $0xe0] sm:$0xff] }
  0x82   :  { %v293_v19 = vpack.c.bf16 %v274_v59, %v273_v56  ;;  %v1015_v58 = vadd.f32 %v1014_v57, %v972_v62  ;;  %vm1789_vm8 = vcmp.lt.f32.partialorder %v813_v13, 1.0  ;;  %v909_v26 = vmul.f32 %v877_v37, %v781_v43 }
  0x83   :  { %vm1793_vm9 = vcmp.lt.f32.partialorder %v814_v10, 1.0  ;;  %v910_v56 = vmul.f32 %v878_v21, %v782_v23  ;;  %v1079_v59 = vadd.f32 -0.5, %v813_v13  ;;  %v1080_v25 = vadd.f32 -0.5, %v814_v10 }
  0x84   :  { %574 = vmatprep.subr.bf16.mxu1 %v293_v19  ;;  %v229_v16 = vpack.c.bf16 %v210_v61, %v209_v54  ;;  %v166_v24 = vpack.c.bf16 %v1783_v11, %v1777_v47  ;;  %v134_v62 = vpack.c.bf16 %v1787_v60, %v1785_v29  ;;  %v783_v57 = vsub.f32 %v1785_v29, %v1777_v47  ;;  %v1815_v54 = vld [vmem:[#allocation6 + $0xe0] sm:$0xff] }
  0x85   :  { %v1805_v35 = vsub.f32 %v1787_v60, %v1783_v11  ;;  %v973_v23 = vsel %vm1789_vm8, %v909_v26, %v1079_v59  ;;  %v974_v43 = vsel %vm1793_vm9, %v910_v56, %v1080_v25  ;;  %v275_v13 = vmul.f32 %v1777_v47, %v1777_v47  ;;  %v1821_v25 = vld [vmem:[#allocation6 + $0xe8] sm:$0xff] }
  0x86   :  { %575 = vmatpush1.bf16.msra.mxu1 %v229_v16  ;;  %v276_v10 = vmul.f32 %v1783_v11, %v1783_v11  ;;  %v1016_v37 = vadd.f32 %v1015_v58, %v973_v23  ;;  %515 = vmatprep.subr.bf16.mxu0 %v166_v24  ;;  %v815_v21 = vand.u32 2147483647, %v783_v57  ;;  %v879_v19 = vmul.f32 0.5, %v783_v57  ;;  %v1825_v26 = vld [vmem:[#allocation3 + $0xe8] sm:$0xff] }
  0x87   :  { %2100 = vst [vmem:[#allocation27_spill] sm:$0xff] %v1805_v35  ;;  %516 = vmatpush1.bf16.msra.mxu0 %v134_v62  ;;  %v211_v30 = vmul.f32 %v1785_v29, %v1785_v29  ;;  %v212_v16 = vmul.f32 %v1787_v60, %v1787_v60  ;;  %v167_v62 = vpack.c.bf16 %v1821_v25, %v1815_v54  ;;  %vm984_vm0 = vcmask 1043456  }
  0x88   :  { %v294_v61 = vpack.c.bf16 %v276_v10, %v275_v13  ;;  %v1017_v58 = vadd.f32 %v1016_v37, %v974_v43  ;;  %vm847_vm10 = vcmp.lt.f32.partialorder %v815_v21, 1.0  ;;  %v911_v24 = vmul.f32 %v879_v19, %v783_v57  ;;  %v1845_v19 = vld [vmem:[#allocation6 + $0xf0] sm:$0xff] }
  0x89   :  { %v1081_v56 = vadd.f32 -0.5, %v815_v21  ;;  %v230_v59 = vpack.c.bf16 %v212_v16, %v211_v30  ;;  %v135_v23 = vpack.c.bf16 %v1825_v26, %v1823_v50  ;;  %v1833_v13 = vsub.f32 %v1823_v50, %v1815_v54  ;;  %517 = vmatprep.subr.bf16.mxu0 %v167_v62 }
  0x8a   :  { %576 = vmatprep.subr.bf16.mxu1 %v294_v61  ;;  %v1837_v10 = vsub.f32 %v1825_v26, %v1821_v25  ;;  %v277_v57 = vmul.f32 %v1815_v54, %v1815_v54  ;;  %v278_v37 = vmul.f32 %v1821_v25, %v1821_v25  ;;  %v1847_v61 = vld [vmem:[#allocation6 + $0xf8] sm:$0xff]  ;;  %v213_v16 = vmul.f32 %v1823_v50, %v1823_v50 }
  0x8b   :  { %2101 = vst [vmem:[#allocation28_spill] sm:$0xff] %v1833_v13  ;;  %v975_v43 = vsel %vm847_vm10, %v911_v24, %v1081_v56  ;;  %577 = vmatpush1.bf16.msra.mxu1 %v230_v59  ;;  %518 = vmatpush1.bf16.msra.mxu0 %v135_v23  ;;  %v214_v24 = vmul.f32 %v1825_v26, %v1825_v26  ;;  %v1853_v56 = vld [vmem:[#allocation3 + $0xf0] sm:$0xff]  ;;  %v1855_v59 = vld [vmem:[#allocation3 + $0xf8] sm:$0xff]  ;;  %vm1030_vm1 = vcmask 1040384  }
  0x8c   :  { %2102 = vst [vmem:[#allocation29_spill] sm:$0xff] %v1837_v10  ;;  %v1843_v21 = vadd.f32 %v1017_v58, %v975_v43  ;;  %v295_v30 = vpack.c.bf16 %v278_v37, %v277_v57  ;;  %v168_v62 = vpack.c.bf16 %v1847_v61, %v1845_v19  ;;  %v136_v43 = vpack.c.bf16 %v1855_v59, %v1853_v56 }
  0x8d   :  { %v231_v58 = vpack.c.bf16 %v214_v24, %v213_v16  ;;  %v1863_v23 = vsub.f32 %v1853_v56, %v1845_v19  ;;  %v1867_v57 = vsub.f32 %v1855_v59, %v1847_v61  ;;  %v279_v37 = vmul.f32 %v1845_v19, %v1845_v19 }
  0x8e   :  { %2103 = vst [vmem:[#allocation30_spill] sm:$0xff] %v1843_v21  ;;  %578 = vmatprep.subr.bf16.mxu1 %v295_v30  ;;  %519 = vmatprep.subr.bf16.mxu0 %v168_v62  ;;  %v280_v30 = vmul.f32 %v1847_v61, %v1847_v61  ;;  %v215_v16 = vmul.f32 %v1853_v56, %v1853_v56  ;;  %v1877_v21 = vld [vmem:[#allocation8] ss:$8 sps:$4 sm:$0xff]   ;;  %v1883_v62 = vld [vmem:[#allocation8 + $0x14] ss:$8 sps:$4 sm:$0xff]  }
  0x8f   :  { %2104 = vst [vmem:[#allocation31_spill] sm:$0xff] %v1863_v23  ;;  %2105 = vst [vmem:[#allocation32_spill] sm:$0xff] %v1867_v57  ;;  %579 = vmatpush1.bf16.msra.mxu1 %v231_v58  ;;  %v216_v24 = vmul.f32 %v1855_v59, %v1855_v59  ;;  %520 = vmatpush1.bf16.msra.mxu0 %v136_v43  ;;  %v329_v57 = vmul.f32 %v1597_v28, %v1605_v36 }
  0x90   :  { %v296_v23 = vpack.c.bf16 %v280_v30, %v279_v37  ;;  %v330_v58 = vmul.f32 %v1603_v33, %v1607_v38  ;;  %v313_v35 = vmul.f32 %v1333_v0, %v1337_v2  ;;  %v314_v43 = vmul.f32 %v1335_v1, %v1341_v4 }
  0x91   :  { %v232_v10 = vpack.c.bf16 %v216_v24, %v215_v16  ;;  %v331_v37 = vmul.f32 %v1633_v22, %v1641_v32  ;;  %v332_v28 = vmul.f32 %v1639_v31, %v1643_v39  ;;  %v315_v33 = vmul.f32 %v1349_v8, %v1361_v14  ;;  %v2117_v16 = vld [vmem:[#allocation23_spill] sm:$0xff] }
  0x92   :  { %580 = vmatprep.subr.bf16.mxu1 %v296_v23  ;;  %522 = vmatmul.mubr.bf16.vlgmr.msra.gmra.mrb[0].mxu0 %v1877_v21  ;;  %v353_v13 = vpack.c.bf16 %v330_v58, %v329_v57  ;;  %v316_v36 = vmul.f32 %v1351_v9, %v1363_v15  ;;  %v345_v38 = vpack.c.bf16 %v314_v43, %v313_v35  ;;  %v1912_v35 = vld [vmem:[#allocation8 + $0x10] ss:$8 sps:$4 sm:$0xff]   ;;  %v2115_v23 = vld [vmem:[#allocation20_spill] sm:$0xff] }
  0x93   :  { %581 = vmatpush1.bf16.msra.mxu1 %v232_v10  ;;  %v333_v0 = vmul.f32 %v1669_v27, %v1677_v53  ;;  %v334_v1 = vmul.f32 %v1675_v52, %v1679_v42  ;;  %v354_v2 = vpack.c.bf16 %v332_v28, %v331_v37  ;;  %v317_v22 = vmul.f32 %v1389_v40, %v1393_v45  ;;  %v381_v40 = vld [vmem:[#allocation8 + $0x20] sm:$0x33]  ;;  %v2114_v10 = vld [vmem:[#allocation22_spill] sm:$0xff] }
  0x94   :  { %1087 = vmatprep.subr.bf16.mxu0 %v353_v13  ;;  %1121 = vmatprep.subr.bf16.mxu1 %v353_v13  ;;  %v346_v4 = vpack.c.bf16 %v316_v36, %v315_v33  ;;  %v318_v8 = vmul.f32 %v1391_v41, %v1395_v46  ;;  %v335_v9 = vmul.f32 %v1705_v51, %v1713_v12  ;;  %v2107_v12 = vld [vmem:[#allocation17_spill] sm:$0xff]  ;;  %v2118_v58 = vld [vmem:[#allocation26_spill] sm:$0xff]  ;;  %v2119_v43 = vld [vmem:[#allocation24_spill] sm:$0xff] }
  0x95   :  { %531 = vmatprep.mubr.bf16.mxu0 %v1883_v62  ;;  %1088 = vmatpush3.bf16.msra.mxu0 %v345_v38  ;;  %v336_v14 = vmul.f32 %v1711_v5, %v1715_v55  ;;  %v355_v15 = vpack.c.bf16 %v334_v1, %v333_v0  ;;  %v319_v41 = vmul.f32 %v1419_v63, %v1427_v17  ;;  %v2108_v55 = vld [vmem:[#allocation15_spill] sm:$0xff] }
  0x96   :  { %583 = vmatmul.mubr.bf16.vlgmr.msra.gmra.mrb[0].mxu1 %v1877_v21  ;;  %1089 = vmatprep.subr.bf16.mxu0 %v354_v2  ;;  %v347_v45 = vpack.c.bf16 %v318_v8, %v317_v22  ;;  %v320_v46 = vmul.f32 %v1421_v3, %v1429_v18  ;;  %v337_v32 = vmul.f32 %v1741_v7, %v1749_v20  ;;  %v2106_v3 = vld [vmem:[#allocation13_spill] sm:$0xff]  ;;  %v2110_v7 = vld [vmem:[#allocation16_spill] sm:$0xff] }
  0x97   :  { %1129 = vmatpush3.bf16.msra.mxu1 %v345_v38  ;;  %592 = vmatprep.mubr.bf16.mxu1 %v1883_v62  ;;  %v356_v31 = vpack.c.bf16 %v336_v14, %v335_v9  ;;  %v338_v39 = vmul.f32 %v1747_v6, %v1751_v44  ;;  %v1054_v27 = vcombine.high %v381_v40, %v381_v40  ;;  %v2123_v38 = vld [vmem:[#allocation28_spill] sm:$0xff]  ;;  %v2125_v14 = vld [vmem:[#allocation31_spill] sm:$0xff] }
  0x98   :  { %1122 = vmatprep.subr.bf16.mxu1 %v354_v2  ;;  %v348_v52 = vpack.c.bf16 %v320_v46, %v319_v41  ;;  %v321_v63 = vmul.f32 %v1449_v34, %v1457_v48  ;;  %v322_v17 = vmul.f32 %v2106_v3, %v1459_v49  ;;  %v339_v53 = vmul.f32 %v1777_v47, %v1785_v29  ;;  %v2109_v48 = vld [vmem:[#allocation18_spill] sm:$0xff]  ;;  %v2112_v29 = vld [vmem:[#allocation21_spill] sm:$0xff] }
  0x99   :  { %1090 = vmatpush3.bf16.msra.mxu0 %v346_v4  ;;  %v357_v18 = vpack.c.bf16 %v338_v39, %v337_v32  ;;  %v340_v42 = vmul.f32 %v1783_v11, %v1787_v60  ;;  %v1053_v51 = vcombine.low %v381_v40, %v381_v40  ;;  %v323_v34 = vmul.f32 %v2108_v55, %v2107_v12  ;;  %v2111_v47 = vld [vmem:[#allocation14_spill] sm:$0xff]  ;;  %v2113_v60 = vld [vmem:[#allocation19_spill] sm:$0xff] }
  0x9a   :  { %1091 = vmatprep.subr.bf16.mxu0 %v355_v15  ;;  %532 = vmatmul.mubr.bf16.gmra.mrb[4].mxu0 %v1912_v35  ;;  %v349_v5 = vpack.c.bf16 %v322_v17, %v321_v63  ;;  %v324_v49 = vmul.f32 %v2110_v7, %v2109_v48  ;;  %v341_v20 = vmul.f32 %v1815_v54, %v1823_v50  ;;  %v817_v0 = vand.u32 2147483647, %v2123_v38  ;;  %v2127_v32 = vld [vmem:[#allocation30_spill] sm:$0xff] }
  0x9b   :  { %1130 = vmatpush3.bf16.msra.mxu1 %v346_v4  ;;  %541 = vmatprep.mubr.bf16.mxu0 %v1054_v27  ;;  %v358_v6 = vpack.c.bf16 %v340_v42, %v339_v53  ;;  %v342_v44 = vmul.f32 %v1821_v25, %v1825_v26  ;;  %v325_v13 = vmul.f32 %v2113_v60, %v2112_v29  ;;  %v2116_v26 = vld [vmem:[#allocation25_spill] sm:$0xff]  ;;  %v881_v1 = vmul.f32 0.5, %v2123_v38 }
  0x9c   :  { %1123 = vmatprep.subr.bf16.mxu1 %v355_v15  ;;  %v350_v11 = vpack.c.bf16 %v324_v49, %v323_v34  ;;  %v326_v57 = vmul.f32 %v2115_v23, %v2114_v10  ;;  %v343_v54 = vmul.f32 %v1845_v19, %v1853_v56  ;;  %v344_v25 = vmul.f32 %v1847_v61, %v1855_v59  ;;  %v2120_v61 = vld [vmem:[#allocation27_spill] sm:$0xff] }
  0x9d   :  { %1092 = vmatpush3.bf16.msra.mxu0 %v347_v45  ;;  %v359_v30 = vpack.c.bf16 %v342_v44, %v341_v20  ;;  %v327_v24 = vmul.f32 %v2117_v16, %v2116_v26  ;;  %v328_v37 = vmul.f32 %v2119_v43, %v2118_v58  ;;  %v816_v56 = vand.u32 2147483647, %v2120_v61 }
  0x9e   :  { %593 = vmatmul.mubr.bf16.gmra.mrb[4].mxu1 %v1912_v35  ;;  %1093 = vmatprep.subr.bf16.mxu0 %v356_v31  ;;  %v351_v50 = vpack.c.bf16 %v326_v57, %v325_v13  ;;  %v360_v28 = vpack.c.bf16 %v344_v25, %v343_v54  ;;  %v880_v59 = vmul.f32 0.5, %v2120_v61  ;;  %v913_v8 = vmul.f32 %v881_v1, %v2123_v38 }
  0x9f   :  { %1131 = vmatpush3.bf16.msra.mxu1 %v347_v45  ;;  %602 = vmatprep.mubr.bf16.mxu1 %v1054_v27  ;;  %v352_v19 = vpack.c.bf16 %v328_v37, %v327_v24  ;;  %v1082_v33 = vadd.f32 -0.5, %v816_v56  ;;  %vm1960_vm11 = vcmp.lt.f32.partialorder %v816_v56, 1.0  ;;  %v1083_v9 = vadd.f32 -0.5, %v817_v0 }
  0xa0   :  { %1124 = vmatprep.subr.bf16.mxu1 %v356_v31  ;;  %v819_v15 = vand.u32 2147483647, %v2125_v14  ;;  %vm849_vm12 = vcmp.lt.f32.partialorder %v817_v0, 1.0  ;;  %v2126_v31 = vld [vmem:[#allocation32_spill] sm:$0xff] }
  0xa1   :  { %1094 = vmatpush3.bf16.msra.mxu0 %v348_v52  ;;  %v820_v41 = vand.u32 2147483647, %v2126_v31  ;;  %v884_v46 = vmul.f32 0.5, %v2126_v31  ;;  %v977_v63 = vsel %vm849_vm12, %v913_v8, %v1083_v9 }
  0xa2   :  { %1095 = vmatprep.subr.bf16.mxu0 %v357_v18  ;;  %542 = vmatmul.mubr.bf16.gmra.mrb[8].mxu0 %v1053_v51  ;;  %vm851_vm14 = vcmp.lt.f32.partialorder %v819_v15, 1.0 }
  0xa3   :  { %1132 = vmatpush3.bf16.msra.mxu1 %v348_v52  ;;  %643 = vmatprep.mubr.bf16.mxu0 %v2111_v47  ;;  %v1085_v52 = vadd.f32 -0.5, %v819_v15  ;;  %v916_v17 = vmul.f32 %v884_v46, %v2126_v31  ;;  %vm852_vm15 = vcmp.lt.f32.partialorder %v820_v41, 1.0 }
  0xa4   :  { %1125 = vmatprep.subr.bf16.mxu1 %v357_v18  ;;  %v1086_v18 = vadd.f32 -0.5, %v820_v41 }
  0xa5   :  { %1096 = vmatpush3.bf16.msra.mxu0 %v349_v5 }
  0xa6   :  { %603 = vmatmul.mubr.bf16.gmra.mrb[8].mxu1 %v1053_v51  ;;  %1097 = vmatprep.subr.bf16.mxu0 %v358_v6  ;;  %v980_v12 = vsel %vm852_vm15, %v916_v17, %v1086_v18 }
  0xa7   :  { %1133 = vmatpush3.bf16.msra.mxu1 %v349_v5  ;;  %651 = vmatprep.mubr.bf16.mxu1 %v1883_v62  ;;  %v912_v62 = vmul.f32 %v880_v59, %v2120_v61 }
  0xa8   :  { %1126 = vmatprep.subr.bf16.mxu1 %v358_v6 }
  0xa9   :  { %1098 = vmatpush3.bf16.msra.mxu0 %v350_v11  ;;  %v976_v22 = vsel %vm1960_vm11, %v912_v62, %v1082_v33 }
  0xaa   :  { %1099 = vmatprep.subr.bf16.mxu0 %v359_v30  ;;  %v1019_v39 = vadd.f32 %v2127_v32, %v976_v22 }
  0xab   :  { %1134 = vmatpush3.bf16.msra.mxu1 %v350_v11 }
  0xac   :  { %1127 = vmatprep.subr.bf16.mxu1 %v359_v30  ;;  %v1020_v3 = vadd.f32 %v1019_v39, %v977_v63 }
  0xad   :  { %1100 = vmatpush3.bf16.msra.mxu0 %v351_v50 }
  0xae   :  { %1101 = vmatprep.subr.bf16.mxu0 %v360_v28 }
  0xaf   :  { %1135 = vmatpush3.bf16.msra.mxu1 %v351_v50 }
  0xb0   :  { %1128 = vmatprep.subr.bf16.mxu1 %v360_v28 }
  0xb1   :  { %1102 = vmatpush3.bf16.msra.mxu0 %v352_v19 }
  0xb3   :  { %1136 = vmatpush3.bf16.msra.mxu1 %v352_v19 }
  0xb4   :  { %644 = vmatmul.mubr.bf16.vlgmr.msra.gmra.mrb[12].mxu0 %v1877_v21  ;;  %v2124_v21 = vld [vmem:[#allocation29_spill] sm:$0xff] }
  0xb5   :  { %v818_v2 = vand.u32 2147483647, %v2124_v21  ;;  %v882_v4 = vmul.f32 0.5, %v2124_v21 }
  0xb6   :  { %652 = vmatmul.mubr.bf16.vlgmr.msra.gmra.mrb[12].mxu1 %v1912_v35  ;;  %v883_v35 = vmul.f32 0.5, %v2125_v14 }
  0xb7   :  { %659 = vmatprep.mubr.bf16.mxu1 %v1054_v27  ;;  %v914_v40 = vmul.f32 %v882_v4, %v2124_v21  ;;  %v1084_v45 = vadd.f32 -0.5, %v818_v2  ;;  %vm850_vm13 = vcmp.lt.f32.partialorder %v818_v2, 1.0 }
  0xb8   :  { %v915_v27 = vmul.f32 %v883_v35, %v2125_v14 }
  0xb9   :  { %v978_v53 = vsel %vm850_vm13, %v914_v40, %v1084_v45 }
  0xba   :  { %v1021_v42 = vadd.f32 %v1020_v3, %v978_v53 }
  0xbe   :  { %660 = vmatmul.mubr.bf16.gmra.mrb[16].mxu1 %v1053_v51  ;;  %v979_v51 = vsel %vm851_vm14, %v915_v27, %v1085_v52 }
  0xbf   :  { %v1022_v5 = vadd.f32 %v1021_v42, %v979_v51 }
  0xc1   :  { %v1979_v55 = vadd.f32 %v1022_v5, %v980_v12 }
 0x165   :  { %v523_v34 = vpop.f32.mrb[0].mxu0 }
 0x166   :  { %v667_v48 = vmul.f32 %v523_v34, %v523_v34  ;;  %v525_v7 = vpop.f32.mrb[1].mxu0 }
 0x167   :  { %v672_v49 = vmul.f32 %v525_v7, %v525_v7  ;;  %v1981_v6 = vmul.f32 %v525_v7, %v523_v34  ;;  %v527_v20 = vpop.f32.mrb[2].mxu0 }
 0x168   :  { %v668_v44 = vmul.f32 %v527_v20, %v527_v20  ;;  %v529_v47 = vpop.f32.mrb[3].mxu0 }
 0x169   :  { %v722_v11 = vadd.f32 %v672_v49, %v667_v48  ;;  %v584_v29 = vpop.f32.mrb[0].mxu1  ;;  %v673_v60 = vmul.f32 %v529_v47, %v529_v47  ;;  %v1983_v13 = vmul.f32 %v529_v47, %v527_v20 }
 0x16a   :  { %v682_v10 = vsub.f32 %v584_v29, %v667_v48  ;;  %v586_v23 = vpop.f32.mrb[1].mxu1 }
 0x16b   :  { %v723_v57 = vadd.f32 %v673_v60, %v668_v44  ;;  %v588_v30 = vpop.f32.mrb[2].mxu1  ;;  %v687_v54 = vsub.f32 %v586_v23, %v672_v49  ;;  %v727_v16 = vadd.f32 0.0001, %v722_v11 }
 0x16c   :  { %v683_v25 = vsub.f32 %v588_v30, %v668_v44  ;;  %v590_v50 = vpop.f32.mrb[3].mxu1 }
 0x16d   :  { %v688_v26 = vsub.f32 %v590_v50, %v673_v60  ;;  %v732_v24 = vadd.f32 %v687_v54, %v682_v10  ;;  %v728_v58 = vadd.f32 0.0001, %v723_v57  ;;  %v533_v37 = vpop.f32.mrb[4].mxu0 }
 0x16e   :  { %v669_v19 = vmul.f32 %v533_v37, %v533_v37  ;;  %v535_v61 = vpop.f32.mrb[5].mxu0 }
 0x16f   :  { %v733_v43 = vadd.f32 %v688_v26, %v683_v25  ;;  %v737_v28 = vadd.f32 0.0009, %v732_v24  ;;  %v674_v59 = vmul.f32 %v535_v61, %v535_v61  ;;  %v1985_v62 = vmul.f32 %v535_v61, %v533_v37  ;;  %v537_v33 = vpop.f32.mrb[6].mxu0 }
 0x170   :  { %v670_v0 = vmul.f32 %v537_v33, %v537_v33  ;;  %v539_v21 = vpop.f32.mrb[7].mxu0 }
 0x171   :  { %v738_v56 = vadd.f32 0.0009, %v733_v43  ;;  %v594_v36 = vpop.f32.mrb[4].mxu1  ;;  %v742_v38 = vmul.f32 %v737_v28, %v727_v16  ;;  %v724_v22 = vadd.f32 %v674_v59, %v669_v19  ;;  %v675_v8 = vmul.f32 %v539_v21, %v539_v21 }
 0x172   :  { %v684_v1 = vsub.f32 %v594_v36, %v669_v19  ;;  %v596_v2 = vpop.f32.mrb[5].mxu1  ;;  %v1987_v14 = vmul.f32 %v539_v21, %v537_v33  ;;  %v699_v19 = vmul.f32 2.0, %v1985_v62 }
 0x173   :  { %v743_v4 = vmul.f32 %v738_v56, %v728_v58  ;;  %v598_v9 = vpop.f32.mrb[6].mxu1  ;;  %v689_v15 = vsub.f32 %v596_v2, %v674_v59  ;;  %v725_v45 = vadd.f32 %v675_v8, %v670_v0  ;;  %v729_v31 = vadd.f32 0.0001, %v724_v22 }
 0x174   :  { %v685_v35 = vsub.f32 %v598_v9, %v670_v0  ;;  %v600_v40 = vpop.f32.mrb[7].mxu1  ;;  %1151 = vrcp.f32 %v742_v38  ;;  %v697_v58 = vmul.f32 2.0, %v1981_v6  ;;  %v698_v59 = vmul.f32 2.0, %v1983_v13 }
 0x175   :  { %v734_v41 = vadd.f32 %v689_v15, %v684_v1  ;;  %v690_v46 = vsub.f32 %v600_v40, %v675_v8  ;;  %v543_v32 = vpop.f32.mrb[8].mxu0  ;;  %v730_v39 = vadd.f32 0.0001, %v725_v45  ;;  %v700_v38 = vmul.f32 2.0, %v1987_v14 }
 0x176   :  { %v671_v63 = vmul.f32 %v543_v32, %v543_v32  ;;  %v545_v3 = vpop.f32.mrb[9].mxu0  ;;  %v702_v21 = vadd.f32 0.0001, %v697_v58  ;;  %v703_v15 = vadd.f32 0.0001, %v698_v59 }
 0x177   :  { %v739_v27 = vadd.f32 0.0009, %v734_v41  ;;  %v735_v52 = vadd.f32 %v690_v46, %v685_v35  ;;  %v676_v18 = vmul.f32 %v545_v3, %v545_v3  ;;  %v1989_v53 = vmul.f32 %v545_v3, %v543_v32  ;;  %v547_v42 = vpop.f32.mrb[10].mxu0 }
 0x178   :  { %v548_v48 = vpop.f32.mrb[11].mxu0 }
 0x179   :  { %v604_v17 = vpop.f32.mrb[8].mxu1  ;;  %v744_v51 = vmul.f32 %v739_v27, %v729_v31  ;;  %v740_v5 = vadd.f32 0.0009, %v735_v52  ;;  %v726_v7 = vadd.f32 %v676_v18, %v671_v63  ;;  %v705_v31 = vadd.f32 0.0001, %v700_v38 }
 0x17a   :  { %v686_v12 = vsub.f32 %v604_v17, %v671_v63  ;;  %v606_v34 = vpop.f32.mrb[9].mxu1  ;;  %v701_v3 = vmul.f32 2.0, %v1989_v53 }
 0x17b   :  { %v691_v49 = vsub.f32 %v606_v34, %v676_v18  ;;  %v608_v20 = vpop.f32.mrb[10].mxu1  ;;  %v745_v44 = vmul.f32 %v740_v5, %v730_v39  ;;  %v731_v11 = vadd.f32 0.0001, %v726_v7  ;;  %1153 = vrcp.f32 %v744_v51 }
 0x17c   :  { %v609_v47 = vpop.f32.mrb[11].mxu1  ;;  %1155 = vrcp.f32 %v743_v4  ;;  %v704_v4 = vadd.f32 0.0001, %v699_v19 }
 0x17d   :  { %v736_v29 = vadd.f32 %v691_v49, %v686_v12  ;;  %1157 = vrcp.f32 %v745_v44  ;;  %v1024_v12 = vrot.slane %v1979_v55, 4  ;;  %v706_v49 = vadd.f32 0.0001, %v701_v3 }
 0x17e   :  { %v1152_v45 = vpop.eup %1151 }
 0x17f   :  { %v741_v60 = vadd.f32 0.0009, %v736_v29  ;;  %v1025_v47 = vadd.f32 %v1024_v12, %v1979_v55 }
 0x181   :  { %v746_v10 = vmul.f32 %v741_v60, %v731_v11 }
 0x183   :  { %1159 = vrcp.f32 %v746_v10 }
 0x185   :  { %v1154_v39 = vpop.eup %1153 }
 0x186   :  { %v1156_v63 = vpop.eup %1155 }
 0x187   :  { %v1103_v23 = vpop.f32.mrb[12].mxu0  ;;  %v1158_v51 = vpop.eup %1157 }
 0x188   :  { %v1104_v57 = vpop.f32.mrb[13].mxu0 }
 0x189   :  { %v1109_v30 = vpop.f32.mrb[12].mxu1  ;;  %v1105_v54 = vadd.f32 %v1104_v57, %v1103_v23  ;;  %v1106_v25 = vpop.f32.mrb[14].mxu0  ;;  %v1026_v23 = vrot.slane %v1025_v47, 2 }
 0x18a   :  { %v1110_v50 = vpop.f32.mrb[13].mxu1  ;;  %v1107_v26 = vpop.f32.mrb[15].mxu0 }
 0x18b   :  { %v1111_v16 = vadd.f32 %v1110_v50, %v1109_v30  ;;  %v1112_v24 = vpop.f32.mrb[14].mxu1  ;;  %v692_v43 = vsub.f32 %v1105_v54, %v1981_v6  ;;  %v1108_v37 = vadd.f32 %v1107_v26, %v1106_v25  ;;  %v1027_v54 = vadd.f32 %v1026_v23, %v1025_v47 }
 0x18c   :  { %v1113_v28 = vpop.f32.mrb[15].mxu1 }
 0x18d   :  { %v694_v61 = vsub.f32 %v1111_v16, %v1985_v62  ;;  %v1114_v56 = vadd.f32 %v1113_v28, %v1112_v24  ;;  %v707_v33 = vmul.f32 2.0, %v692_v43  ;;  %v693_v36 = vsub.f32 %v1108_v37, %v1983_v13  ;;  %v1160_v29 = vpop.eup %1159 }
 0x18e   :  { %v1028_v26 = vrot.slane %v1027_v54, 1 }
 0x18f   :  { %v709_v0 = vmul.f32 2.0, %v694_v61  ;;  %v695_v1 = vsub.f32 %v1114_v56, %v1987_v14  ;;  %v712_v2 = vadd.f32 0.0009, %v707_v33  ;;  %v708_v6 = vmul.f32 2.0, %v693_v36 }
 0x190   :  { %v1029_v58 = vadd.f32 %v1028_v26, %v1027_v54 }
 0x191   :  { %v714_v22 = vadd.f32 0.0009, %v709_v0  ;;  %v710_v8 = vmul.f32 2.0, %v695_v1  ;;  %v1115_v9 = vpop.f32.mrb[16].mxu1  ;;  %v717_v62 = vmul.f32 %v712_v2, %v702_v21  ;;  %v713_v35 = vadd.f32 0.0009, %v708_v6 }
 0x192   :  { %v1116_v40 = vpop.f32.mrb[17].mxu1 }
 0x193   :  { %v719_v13 = vmul.f32 %v714_v22, %v704_v4  ;;  %v715_v41 = vadd.f32 0.0009, %v710_v8  ;;  %v1117_v46 = vadd.f32 %v1116_v40, %v1115_v9  ;;  %v1118_v32 = vpop.f32.mrb[18].mxu1  ;;  %v752_v14 = vmul.f32 %v1152_v45, %v717_v62 }
 0x194   :  { %v718_v27 = vmul.f32 %v713_v35, %v703_v15  ;;  %v1119_v52 = vpop.f32.mrb[19].mxu1 }
 0x195   :  { %v754_v17 = vmul.f32 %v1154_v39, %v719_v13  ;;  %v720_v18 = vmul.f32 %v715_v41, %v705_v31  ;;  %v696_v42 = vsub.f32 %v1117_v46, %v1989_v53 }
 0x196   :  { %v753_v5 = vmul.f32 %v1156_v63, %v718_v27 }
 0x197   :  { %v755_v34 = vmul.f32 %v1158_v51, %v720_v18  ;;  %v711_v48 = vmul.f32 2.0, %v696_v42 }
 0x198   :  { %v981_v7 = vadd.f32 %v753_v5, %v752_v14 }
 0x199   :  { %v716_v20 = vadd.f32 0.0009, %v711_v48 }
 0x19a   :  { %v982_v44 = vadd.f32 %v981_v7, %v754_v17 }
 0x19b   :  { %v721_v11 = vmul.f32 %v716_v20, %v706_v49 }
 0x19c   :  { %v983_v60 = vadd.f32 %v982_v44, %v755_v34 }
 0x19d   :  { %v756_v10 = vmul.f32 %v1160_v29, %v721_v11 }
 0x19f   :  { %v985_v57 = vsel %vm984_vm0, %v756_v10, 0.0 }
 0x1a0   :  { %v986_v53 = vadd.f32 %v985_v57, %v983_v60 }
 0x1a2   :  { %v987_v30 = vrot.slane %v986_v53, 4 }
 0x1a4   :  { %v988_v25 = vadd.f32 %v987_v30, %v986_v53 }
 0x1a6   :  { %v989_v50 = vrot.slane %v988_v25, 2 }
 0x1a8   :  { %v990_v16 = vadd.f32 %v989_v50, %v988_v25 }
 0x1aa   :  { %v991_v24 = vrot.slane %v990_v16, 1 }
 0x1ac   :  { %v992_v55 = vadd.f32 %v991_v24, %v990_v16 }
 0x1ae   :  { %v1031_v43 = vsel %vm1030_vm1, %v992_v55, %v1029_v58 }
 0x1af   :  { %1032 = vst [vmem:[#allocation9] sm:$0x3] %v1031_v43 }
 0x1b0   :  { %1238 = shalt.err (!%p1235_p0)
}
 0x1b1   :  { %s1239_s25 = scalar_lea.hbm %s2018_s3, 32 }
 0x1b2   :  { %p1240_p1 = scmp.ne.s32.totalorder %s2018_s3, %s1239_s25  ;;  %p1243_p2 = scmp.lt.u32.totalorder %s1239_s25, %s2018_s3 }
 0x1b4   :  { %p1245_p3 = pnand %p1243_p2, %p1240_p1 }
 0x1b6   :  { %1248 = shalt.err (!%p1245_p3)
}
 0x1b7   :  { %1042 = dma.vmem_to_hbm [thread:$0]  %s1040_s21, 32, %s2018_s3, [#allocation5]  }
 0x1b8   :  { %1253 = dma.done.wait [#allocation5], 32  }
 0x1b9   :  { %1254 = vsyncadd [#allocation5], 4294967264 }
 0x1ba   :  { %1046 = vsyncpa [#allocation4], 1 }
 0x1bb   :  { %1047 = vsyncpa [#allocation7], 1 }
 0x1bc   :  { %1048 = vsyncpa [#allocation5], 1 }

</bundles_post_ra>
